<compile_context>
chip_gen: v6e
topology: v6e:2x2x1
jax: 0.10.0
libtpu: 0.0.40
codegen_flags: <defaults>
</compile_context>

<pallas_src>
import functools

import jax
import jax.numpy as jnp
import numpy as np
from jax.experimental import pallas as pl
from jax.experimental.pallas import tpu as pltpu


def _sum_layer_kernel(x_ref, out_ref, p1buf_ref):
    """One batch tile: x_ref (2, 10, TB) logits -> out_ref (19, TB) probabilities.

    Layout: class / output axes on sublanes, batch axis on lanes, so every
    vector op and the output writeback are lane-dense.

    p1buf_ref: (28, TB) VMEM scratch holding the digit-1 probabilities padded
    by 9 zero rows on each side; each of the 10 shifted convolution windows is
    then a plain static-offset load and the zero fill implements the boundary.
    """
    tb = out_ref.shape[1]

    # ---- fused softmax over the class axis for BOTH digit rows at once ----
    x = x_ref[...]                                   # (2, 10, TB) f32
    m = jnp.max(x, axis=1, keepdims=True)            # (2, 1, TB)  sublane reduce
    e = jnp.exp(x - m)                               # EUP
    z = jnp.sum(e, axis=1, keepdims=True)            # (2, 1, TB)  sublane reduce
    # Exact normalization (the approx-reciprocal fast path cost ~7e-3 relative
    # error and failed the correctness check); one divide per (digit, sample),
    # then a broadcast multiply.
    p = e * (1.0 / z)                                 # (2, 10, TB)

    p0 = p[0]                                         # (10, TB)

    # ---- digit-1 probabilities, zero-padded, staged in VMEM ---------------
    # NOTE: the pad rows are rewritten every grid step on purpose: gating the
    # init on pl.program_id(0) == 0 would be wrong under "parallel" semantics
    # on v7x (the second TensorCore never executes step 0). ~18 stores/step.
    zpad = jnp.zeros((9, tb), jnp.float32)
    p1buf_ref[0:9, :] = zpad
    p1buf_ref[19:28, :] = zpad
    p1buf_ref[9:19, :] = p[1]

    # ---- linear convolution: out[s, b] = sum_i p0[i, b] * p1[s - i, b] ----
    # The window starting at row (9 - i) of the padded buffer is exactly p1
    # shifted down by i with zero fill; each shift is a static-offset VMEM load
    # (no XLU rotations, no MXU).
    acc = p0[0:1, :] * p1buf_ref[9:28, :]             # i = 0
    for i in range(1, 10):                            # static unroll (tiny)
        acc = acc + p0[i:i + 1, :] * p1buf_ref[9 - i:28 - i, :]
    out_ref[...] = acc


def _round_up(n, m):
    return ((n + m - 1) // m) * m


def _choose_tile(batch, tb_max):
    """Batch tile: multiple of 128, <= tb_max (clamped to 4096 for v5e scoped
    VMEM), and small enough that the grid keeps >= 2 steps when the batch
    allows it (so both v7x TensorCores get work under the "parallel" axis)."""
    tb_max = min(max(int(tb_max), 128), 4096)
    two_step = _round_up(max((batch + 1) // 2, 1), 128)   # round_up(cdiv(B, 2), 128)
    return max(128, min(tb_max, two_step))


@functools.partial(jax.jit, static_argnames=("tb_max",))
def sum_layer_explicit_feature_major(x, tb_max=1024):
    """Primary (zero-relayout) entry point.

    x: (2, 10, B) float logits, feature-major (class on sublanes, batch on
    lanes). Returns (19, B) float32 digit-sum probabilities. No wrapper-side
    transposes: the kernel's lane-dense layout is the HBM layout.
    """
    assert x.shape[:2] == (2, 10), x.shape
    B = x.shape[2]
    tb = _choose_tile(B, tb_max)
    bp = _round_up(B, tb)

    x = x.astype(jnp.float32)
    if bp != B:
        # Zero-logit padding: softmax of zeros is well defined; padded columns
        # are sliced away below.
        x = jnp.pad(x, ((0, 0), (0, 0), (0, bp - B)))

    out = pl.pallas_call(
        _sum_layer_kernel,
        out_shape=jax.ShapeDtypeStruct((19, bp), jnp.float32),
        grid=(bp // tb,),
        in_specs=[pl.BlockSpec((2, 10, tb), lambda b: (0, 0, b))],
        out_specs=pl.BlockSpec((19, tb), lambda b: (0, b)),
        scratch_shapes=[pltpu.VMEM((28, tb), jnp.float32)],
        # Batch tiles are independent -> shard the grid across v7x's two
        # TensorCores (harmless no-op on single-TC v5e / v6e).
        compiler_params=pltpu.CompilerParams(dimension_semantics=("parallel",)),
    )(x)

    return out if bp == B else out[:, :B]


@jax.jit
def sum_layer_explicit_batched(digits):
    """Module-layout convenience wrapper: (B, 2, 10) logits -> (B, 19).

    The transpose-in / transpose-out are pure layout plumbing; callers that can
    keep activations feature-major should use sum_layer_explicit_feature_major
    directly and avoid the two extra HBM passes.
    """
    assert digits.ndim == 3 and digits.shape[1:] == (2, 10), digits.shape
    x = jnp.transpose(digits.astype(jnp.float32), (1, 2, 0))    # (2, 10, B)
    return sum_layer_explicit_feature_major(x).T                # (B, 19)


def sum_layer_explicit(digits):
    """Module-equivalent forward: (2, 10) logits -> (1, 19), like the PyTorch module."""
    assert digits.shape == (2, 10), digits.shape
    return sum_layer_explicit_batched(digits[None])             # (1, 19)


if __name__ == "__main__":
    key = jax.random.PRNGKey(0)
    k_single, k_batch = jax.random.split(key)

    # -- module-shaped input: digits (2, 10) -> out (1, 19) -------------------
    digits = jax.random.normal(k_single, (2, 10), dtype=jnp.float32)
    out = jax.block_until_ready(sum_layer_explicit(digits))

    p = jax.nn.softmax(digits, axis=1)
    ref = jnp.convolve(p[0], p[1])[None, :]          # anti-diagonal sums == linear conv
    np.testing.assert_allclose(np.asarray(out), np.asarray(ref), rtol=1e-4, atol=1e-6)

    # -- batched module-layout path --------------------------------------------
    B = 256
    batch = jax.random.normal(k_batch, (B, 2, 10), dtype=jnp.float32)
    out_b = jax.block_until_ready(sum_layer_explicit_batched(batch))

    p_b = jax.nn.softmax(batch, axis=-1)
    ref_b = jax.vmap(jnp.convolve)(p_b[:, 0, :], p_b[:, 1, :])   # (B, 19)
    np.testing.assert_allclose(np.asarray(out_b), np.asarray(ref_b), rtol=1e-4, atol=1e-6)

    # -- feature-major (zero-relayout) hot path --------------------------------
    x_fm = jnp.transpose(batch, (1, 2, 0))                       # (2, 10, B)
    out_fm = jax.block_until_ready(sum_layer_explicit_feature_major(x_fm))
    np.testing.assert_allclose(np.asarray(out_fm), np.asarray(ref_b.T),
                               rtol=1e-4, atol=1e-6)

    print("KERNEL_OK")
</pallas_src>

<mosaic_0001>
module attributes {stable_mosaic.version = 11 : i64} {
  func.func @_sum_layer_kernel(%arg0: i32, %arg1: memref<2x10x128xf32, #tpu.memory_space<vmem>>, %arg2: memref<19x128xf32, #tpu.memory_space<vmem>>, %arg3: memref<28x128xf32, #tpu.memory_space<vmem>>) attributes {dimension_semantics = [#tpu.dimension_semantics<parallel>], iteration_bounds = array<i64: 1>, scalar_prefetch = 0 : i64, scratch_operands = 1 : i64, tpu.core_type = #tpu.core_type<tc>, window_params = [{transform_indices = @transform_0, window_bounds = array<i64: 2, 10, 128>}, {transform_indices = @transform_1, window_bounds = array<i64: 19, 128>}]} {
    %c0 = arith.constant 0 : index
    %c0_0 = arith.constant 0 : index
    %c0_1 = arith.constant 0 : index
    %0 = vector.load %arg1[%c0, %c0_0, %c0_1] : memref<2x10x128xf32, #tpu.memory_space<vmem>>, vector<2x10x128xf32>
    %cst = arith.constant dense<0xFF800000> : vector<2x128xf32>
    %1 = vector.multi_reduction <maximumf>, %0, %cst [1] : vector<2x10x128xf32> to vector<2x128xf32>
    %2 = vector.shape_cast %1 : vector<2x128xf32> to vector<2x1x128xf32>
    %3 = vector.broadcast %2 : vector<2x1x128xf32> to vector<2x10x128xf32>
    %4 = arith.subf %0, %3 : vector<2x10x128xf32>
    %5 = math.exp %4 : vector<2x10x128xf32>
    %cst_2 = arith.constant dense<0.000000e+00> : vector<2x128xf32>
    %6 = vector.multi_reduction <add>, %5, %cst_2 [1] : vector<2x10x128xf32> to vector<2x128xf32>
    %7 = vector.shape_cast %6 : vector<2x128xf32> to vector<2x1x128xf32>
    %cst_3 = arith.constant 1.000000e+00 : f32
    %8 = vector.broadcast %cst_3 : f32 to vector<2x1x128xf32>
    %9 = arith.divf %8, %7 : vector<2x1x128xf32>
    %10 = vector.broadcast %9 : vector<2x1x128xf32> to vector<2x10x128xf32>
    %11 = arith.mulf %5, %10 : vector<2x10x128xf32>
    %12 = vector.extract_strided_slice %11 {offsets = [0, 0, 0], sizes = [1, 10, 128], strides = [1, 1, 1]} : vector<2x10x128xf32> to vector<1x10x128xf32>
    %13 = vector.shape_cast %12 : vector<1x10x128xf32> to vector<10x128xf32>
    %cst_4 = arith.constant 0.000000e+00 : f32
    %14 = vector.broadcast %cst_4 : f32 to vector<9x128xf32>
    %c0_5 = arith.constant 0 : index
    %c0_6 = arith.constant 0 : index
    %15 = vector.load %arg3[%c0_5, %c0_6] : memref<28x128xf32, #tpu.memory_space<vmem>>, vector<9x128xf32>
    tpu.vector_store %arg3[%c0_5, %c0_6], %14 {strides = array<i32>} : memref<28x128xf32, #tpu.memory_space<vmem>>, vector<9x128xf32>,
    %c19 = arith.constant 19 : index
    %c0_7 = arith.constant 0 : index
    %16 = vector.load %arg3[%c19, %c0_7] : memref<28x128xf32, #tpu.memory_space<vmem>>, vector<9x128xf32>
    tpu.vector_store %arg3[%c19, %c0_7], %14 {strides = array<i32>} : memref<28x128xf32, #tpu.memory_space<vmem>>, vector<9x128xf32>,
    %17 = vector.extract_strided_slice %11 {offsets = [1, 0, 0], sizes = [1, 10, 128], strides = [1, 1, 1]} : vector<2x10x128xf32> to vector<1x10x128xf32>
    %18 = vector.shape_cast %17 : vector<1x10x128xf32> to vector<10x128xf32>
    %c9 = arith.constant 9 : index
    %c0_8 = arith.constant 0 : index
    %19 = vector.load %arg3[%c9, %c0_8] : memref<28x128xf32, #tpu.memory_space<vmem>>, vector<10x128xf32>
    tpu.vector_store %arg3[%c9, %c0_8], %18 {strides = array<i32>} : memref<28x128xf32, #tpu.memory_space<vmem>>, vector<10x128xf32>,
    %20 = vector.extract_strided_slice %13 {offsets = [0, 0], sizes = [1, 128], strides = [1, 1]} : vector<10x128xf32> to vector<1x128xf32>
    %c9_9 = arith.constant 9 : index
    %c0_10 = arith.constant 0 : index
    %21 = vector.load %arg3[%c9_9, %c0_10] : memref<28x128xf32, #tpu.memory_space<vmem>>, vector<19x128xf32>
    %22 = vector.broadcast %20 : vector<1x128xf32> to vector<19x128xf32>
    %23 = arith.mulf %22, %21 : vector<19x128xf32>
    %24 = vector.extract_strided_slice %13 {offsets = [1, 0], sizes = [1, 128], strides = [1, 1]} : vector<10x128xf32> to vector<1x128xf32>
    %c8 = arith.constant 8 : index
    %c0_11 = arith.constant 0 : index
    %25 = vector.load %arg3[%c8, %c0_11] : memref<28x128xf32, #tpu.memory_space<vmem>>, vector<19x128xf32>
    %26 = vector.broadcast %24 : vector<1x128xf32> to vector<19x128xf32>
    %27 = arith.mulf %26, %25 : vector<19x128xf32>
    %28 = arith.addf %23, %27 : vector<19x128xf32>
    %29 = vector.extract_strided_slice %13 {offsets = [2, 0], sizes = [1, 128], strides = [1, 1]} : vector<10x128xf32> to vector<1x128xf32>
    %c7 = arith.constant 7 : index
    %c0_12 = arith.constant 0 : index
    %30 = vector.load %arg3[%c7, %c0_12] : memref<28x128xf32, #tpu.memory_space<vmem>>, vector<19x128xf32>
    %31 = vector.broadcast %29 : vector<1x128xf32> to vector<19x128xf32>
    %32 = arith.mulf %31, %30 : vector<19x128xf32>
    %33 = arith.addf %28, %32 : vector<19x128xf32>
    %34 = vector.extract_strided_slice %13 {offsets = [3, 0], sizes = [1, 128], strides = [1, 1]} : vector<10x128xf32> to vector<1x128xf32>
    %c6 = arith.constant 6 : index
    %c0_13 = arith.constant 0 : index
    %35 = vector.load %arg3[%c6, %c0_13] : memref<28x128xf32, #tpu.memory_space<vmem>>, vector<19x128xf32>
    %36 = vector.broadcast %34 : vector<1x128xf32> to vector<19x128xf32>
    %37 = arith.mulf %36, %35 : vector<19x128xf32>
    %38 = arith.addf %33, %37 : vector<19x128xf32>
    %39 = vector.extract_strided_slice %13 {offsets = [4, 0], sizes = [1, 128], strides = [1, 1]} : vector<10x128xf32> to vector<1x128xf32>
    %c5 = arith.constant 5 : index
    %c0_14 = arith.constant 0 : index
    %40 = vector.load %arg3[%c5, %c0_14] : memref<28x128xf32, #tpu.memory_space<vmem>>, vector<19x128xf32>
    %41 = vector.broadcast %39 : vector<1x128xf32> to vector<19x128xf32>
    %42 = arith.mulf %41, %40 : vector<19x128xf32>
    %43 = arith.addf %38, %42 : vector<19x128xf32>
    %44 = vector.extract_strided_slice %13 {offsets = [5, 0], sizes = [1, 128], strides = [1, 1]} : vector<10x128xf32> to vector<1x128xf32>
    %c4 = arith.constant 4 : index
    %c0_15 = arith.constant 0 : index
    %45 = vector.load %arg3[%c4, %c0_15] : memref<28x128xf32, #tpu.memory_space<vmem>>, vector<19x128xf32>
    %46 = vector.broadcast %44 : vector<1x128xf32> to vector<19x128xf32>
    %47 = arith.mulf %46, %45 : vector<19x128xf32>
    %48 = arith.addf %43, %47 : vector<19x128xf32>
    %49 = vector.extract_strided_slice %13 {offsets = [6, 0], sizes = [1, 128], strides = [1, 1]} : vector<10x128xf32> to vector<1x128xf32>
    %c3 = arith.constant 3 : index
    %c0_16 = arith.constant 0 : index
    %50 = vector.load %arg3[%c3, %c0_16] : memref<28x128xf32, #tpu.memory_space<vmem>>, vector<19x128xf32>
    %51 = vector.broadcast %49 : vector<1x128xf32> to vector<19x128xf32>
    %52 = arith.mulf %51, %50 : vector<19x128xf32>
    %53 = arith.addf %48, %52 : vector<19x128xf32>
    %54 = vector.extract_strided_slice %13 {offsets = [7, 0], sizes = [1, 128], strides = [1, 1]} : vector<10x128xf32> to vector<1x128xf32>
    %c2 = arith.constant 2 : index
    %c0_17 = arith.constant 0 : index
    %55 = vector.load %arg3[%c2, %c0_17] : memref<28x128xf32, #tpu.memory_space<vmem>>, vector<19x128xf32>
    %56 = vector.broadcast %54 : vector<1x128xf32> to vector<19x128xf32>
    %57 = arith.mulf %56, %55 : vector<19x128xf32>
    %58 = arith.addf %53, %57 : vector<19x128xf32>
    %59 = vector.extract_strided_slice %13 {offsets = [8, 0], sizes = [1, 128], strides = [1, 1]} : vector<10x128xf32> to vector<1x128xf32>
    %c1 = arith.constant 1 : index
    %c0_18 = arith.constant 0 : index
    %60 = vector.load %arg3[%c1, %c0_18] : memref<28x128xf32, #tpu.memory_space<vmem>>, vector<19x128xf32>
    %61 = vector.broadcast %59 : vector<1x128xf32> to vector<19x128xf32>
    %62 = arith.mulf %61, %60 : vector<19x128xf32>
    %63 = arith.addf %58, %62 : vector<19x128xf32>
    %64 = vector.extract_strided_slice %13 {offsets = [9, 0], sizes = [1, 128], strides = [1, 1]} : vector<10x128xf32> to vector<1x128xf32>
    %c0_19 = arith.constant 0 : index
    %c0_20 = arith.constant 0 : index
    %65 = vector.load %arg3[%c0_19, %c0_20] : memref<28x128xf32, #tpu.memory_space<vmem>>, vector<19x128xf32>
    %66 = vector.broadcast %64 : vector<1x128xf32> to vector<19x128xf32>
    %67 = arith.mulf %66, %65 : vector<19x128xf32>
    %68 = arith.addf %63, %67 : vector<19x128xf32>
    %c0_21 = arith.constant 0 : index
    %c0_22 = arith.constant 0 : index
    %69 = vector.load %arg2[%c0_21, %c0_22] : memref<19x128xf32, #tpu.memory_space<vmem>>, vector<19x128xf32>
    tpu.vector_store %arg2[%c0_21, %c0_22], %68 {strides = array<i32>} : memref<19x128xf32, #tpu.memory_space<vmem>>, vector<19x128xf32>,
    return
  }
  func.func @transform_0(%arg0: i32) -> (i32, i32, i32) {
    %c0_i32 = arith.constant 0 : i32
    %c0_i32_0 = arith.constant 0 : i32
    %c0_i32_1 = arith.constant 0 : i32
    return %c0_i32, %c0_i32_0, %arg0 : i32, i32, i32
  }
  func.func @transform_1(%arg0: i32) -> (i32, i32) {
    %c0_i32 = arith.constant 0 : i32
    %c0_i32_0 = arith.constant 0 : i32
    return %c0_i32, %arg0 : i32, i32
  }
}

</mosaic_0001>

<bundles_post_ra>
// kernel: sum_layer_explicit_feature_major.1
= control target key start
LH: loop header
LB: loop body
LE: loop exit
PB: predicated region body
PF: predicated region fallthrough
CT: control target
= control target key end

     0   :  { %vm12_vm0 = vcmask 1041408   ;;  %v217_v0 = vmov 0.0   ;;  %v74_v49 = vlaneseq  ;;  %s276_s0 = inlined_call_operand.vmem [shape: f32[2,10,128], index: 0, kind: input, shape index: {}]   ;;  %s277_s1 = inlined_call_operand.vmem [shape: f32[19,128], index: 1, kind: output, shape index: {}]  }
   0x1   :  { %67 = vst [vmem:[#allocation2 + $0x13] sm:$0xff] %v217_v0  ;;  %65 = vst [vmem:[#allocation2] sm:$0xff] %v217_v0  ;;  %v8_v1 = vld [vmem:[%s276_s0] sm:$0xff]  ;;  %v9_v2 = vld [vmem:[%s276_s0 + $0x8] sm:$0x3] }
   0x2   :  { %66 = vst [vmem:[#allocation2 + $0x8] sm:$0x1] %v217_v0  ;;  %68 = vst [vmem:[#allocation2 + $0x1b] sm:$0x1] %v217_v0  ;;  %v10_v3 = vld [vmem:[%s276_s0 + $0x10] sm:$0xff]  ;;  %v13_v5 = vsel %vm12_vm0, %v9_v2, -inf }
   0x3   :  { %v11_v4 = vld [vmem:[%s276_s0 + $0x18] sm:$0x3]  ;;  %v14_v6 = vmax.f32 %v8_v1, %v13_v5  ;;  %v244_v50 = vshrl.u32 %v74_v49, 7 }
   0x4   :  { %v21_v7 = vsel %vm12_vm0, %v11_v4, -inf }
   0x5   :  { %v22_v8 = vmax.f32 %v10_v3, %v21_v7  ;;  %v15_v9 = vrot.slane %v14_v6, 4  ;;  %v76_v52 = vsub.s32 0, %v244_v50  ;;  %v86_v53 = vsub.s32 1, %v244_v50 }
   0x6   :  { %v99_v54 = vsub.s32 2, %v244_v50  ;;  %v112_v55 = vsub.s32 3, %v244_v50  ;;  %v125_v60 = vsub.s32 4, %v244_v50  ;;  %v138_v5 = vsub.s32 5, %v244_v50 }
   0x7   :  { %v23_v10 = vrot.slane %v22_v8, 4  ;;  %v16_v11 = vmax.f32 %v14_v6, %v15_v9 }
   0x8   :  { %v83_v62 = vld [vmem:[#allocation2 + $0x18] sm:$0x7] }
   0x9   :  { %v24_v12 = vmax.f32 %v22_v8, %v23_v10  ;;  %v17_v13 = vrot.slane %v16_v11, 2  ;;  %v73_v61 = vld [vmem:[#allocation2 + $0x19] sm:$0x7]  ;;  %v122_v10 = vld [vmem:[#allocation2 + $0x15] sm:$0x7] }
   0xa   :  { %v96_v63 = vld [vmem:[#allocation2 + $0x17] sm:$0x7] }
   0xb   :  { %v25_v14 = vrot.slane %v24_v12, 2  ;;  %v18_v15 = vmax.f32 %v16_v11, %v17_v13  ;;  %v151_v13 = vsub.s32 6, %v244_v50 }
   0xd   :  { %v26_v16 = vmax.f32 %v24_v12, %v25_v14  ;;  %v19_v17 = vrot.slane %v18_v15, 1 }
   0xf   :  { %v27_v18 = vrot.slane %v26_v16, 1  ;;  %v20_v19 = vmax.f32 %v18_v15, %v19_v17 }
  0x11   :  { %v28_v20 = vmax.f32 %v26_v16, %v27_v18  ;;  %v29_v21 = vsub.f32 %v8_v1, %v20_v19  ;;  %v30_v22 = vsub.f32 %v9_v2, %v20_v19 }
  0x13   :  { %v31_v23 = vsub.f32 %v10_v3, %v28_v20  ;;  %v32_v24 = vsub.f32 %v11_v4, %v28_v20  ;;  %v33_v25 = vmul.f32 1.442695, %v29_v21  ;;  %v35_v28 = vmul.f32 1.442695, %v30_v22  ;;  %v109_v4 = vld [vmem:[#allocation2 + $0x16] sm:$0x7] }
  0x14   :  { %v164_v21 = vsub.s32 7, %v244_v50 }
  0x15   :  { %v37_v26 = vmul.f32 1.442695, %v31_v23  ;;  %v39_v27 = vmul.f32 1.442695, %v32_v24  ;;  %205 = vpow2.f32 %v33_v25  ;;  %v135_v25 = vld [vmem:[#allocation2 + $0x14] sm:$0x7] }
  0x17   :  { %207 = vpow2.f32 %v37_v26 }
  0x18   :  { %209 = vpow2.f32 %v39_v27 }
  0x19   :  { %211 = vpow2.f32 %v35_v28 }
  0x22   :  { %v206_v29 = vpop.eup %205 }
  0x24   :  { %v208_v30 = vpop.eup %207 }
  0x25   :  { %v210_v31 = vpop.eup %209 }
  0x26   :  { %v212_v32 = vpop.eup %211  ;;  %v49_v33 = vsel %vm12_vm0, %v210_v31, 0.0 }
  0x27   :  { %v50_v34 = vadd.f32 %v208_v30, %v49_v33  ;;  %v41_v35 = vsel %vm12_vm0, %v212_v32, 0.0 }
  0x28   :  { %v42_v36 = vadd.f32 %v206_v29, %v41_v35 }
  0x29   :  { %v51_v37 = vrot.slane %v50_v34, 4 }
  0x2a   :  { %v43_v38 = vrot.slane %v42_v36, 4 }
  0x2b   :  { %v52_v39 = vadd.f32 %v51_v37, %v50_v34 }
  0x2c   :  { %v44_v40 = vadd.f32 %v43_v38, %v42_v36 }
  0x2d   :  { %v53_v41 = vrot.slane %v52_v39, 2 }
  0x2e   :  { %v45_v42 = vrot.slane %v44_v40, 2 }
  0x2f   :  { %v54_v43 = vadd.f32 %v53_v41, %v52_v39 }
  0x30   :  { %v46_v44 = vadd.f32 %v45_v42, %v44_v40 }
  0x31   :  { %v55_v45 = vrot.slane %v54_v43, 1 }
  0x32   :  { %v47_v46 = vrot.slane %v46_v44, 1 }
  0x33   :  { %v56_v47 = vadd.f32 %v55_v45, %v54_v43 }
  0x34   :  { %v48_v48 = vadd.f32 %v47_v46, %v46_v44 }
  0x35   :  { %213 = vrcp.f32 %v56_v47 }
  0x36   :  { %215 = vrcp.f32 %v48_v48 }
  0x42   :  { %v214_v51 = vpop.eup %213 }
  0x43   :  { %v216_v56 = vpop.eup %215  ;;  %v250_v57 = vmul.f32 %v214_v51, %v208_v30  ;;  %v64_v58 = vmul.f32 %v214_v51, %v210_v31  ;;  %v148_v31 = vld [vmem:[#allocation2 + $0x13] sm:$0x7] }
  0x44   :  { %v61_v59 = vmul.f32 %v216_v56, %v206_v29  ;;  %v62_v26 = vmul.f32 %v216_v56, %v212_v32 }
  0x45   :  { %69 = vst [vmem:[#allocation2 + $0x9] sm:$0xff] %v250_v57  ;;  %70 = vst [vmem:[#allocation2 + $0x11] sm:$0x3] %v64_v58 }
  0x46   :  { %v77_v0 = vrot.slane %v61_v59, %v76_v52  ;;  %v87_v1 = vrot.slane %v61_v59, %v86_v53  ;;  %v100_v2 = vrot.slane %v61_v59, %v99_v54  ;;  %v113_v3 = vrot.slane %v61_v59, %v112_v55 }
  0x47   :  { %v126_v9 = vrot.slane %v61_v59, %v125_v60  ;;  %v139_v20 = vrot.slane %v61_v59, %v138_v5  ;;  %v152_v28 = vrot.slane %v61_v59, %v151_v13  ;;  %v165_v37 = vrot.slane %v61_v59, %v164_v21 }
  0x48   :  { %v80_v6 = vmul.f32 %v77_v0, %v73_v61  ;;  %v90_v7 = vmul.f32 %v87_v1, %v83_v62  ;;  %v103_v8 = vmul.f32 %v100_v2, %v96_v63  ;;  %v116_v12 = vmul.f32 %v113_v3, %v109_v4 }
  0x49   :  { %v78_v14 = vmul.f32 %v77_v0, %v250_v57  ;;  %v129_v19 = vmul.f32 %v126_v9, %v122_v10  ;;  %v142_v36 = vmul.f32 %v139_v20, %v135_v25  ;;  %v155_v32 = vmul.f32 %v152_v28, %v148_v31 }
  0x4a   :  { %v93_v11 = vadd.f32 %v90_v7, %v80_v6  ;;  %v178_v47 = vrot.slane %v62_v26, %v76_v52  ;;  %v190_v61 = vrot.slane %v62_v26, %v86_v53 }
  0x4c   :  { %v72_v15 = vld [vmem:[#allocation2 + $0x11] sm:$0xff]  ;;  %v259_v16 = vld [vmem:[#allocation2 + $0x8] sm:$0xff]  ;;  %v106_v18 = vadd.f32 %v103_v8, %v93_v11  ;;  %v180_v26 = vmul.f32 %v178_v47, %v250_v57 }
  0x4d   :  { %v82_v17 = vld [vmem:[#allocation2 + $0x10] sm:$0xff]  ;;  %v79_v22 = vmul.f32 %v77_v0, %v72_v15  ;;  %v88_v23 = vmul.f32 %v87_v1, %v259_v16  ;;  %v94_v29 = vld [vmem:[#allocation2 + $0x7] sm:$0xff]  ;;  %v192_v31 = vmul.f32 %v190_v61, %v259_v16 }
  0x4e   :  { %v89_v24 = vmul.f32 %v87_v1, %v82_v17  ;;  %v119_v27 = vadd.f32 %v116_v12, %v106_v18  ;;  %v107_v30 = vld [vmem:[#allocation2 + $0x6] sm:$0xff]  ;;  %v101_v34 = vmul.f32 %v100_v2, %v94_v29  ;;  %v95_v39 = vld [vmem:[#allocation2 + $0xf] sm:$0xff] }
  0x4f   :  { %v91_v33 = vadd.f32 %v88_v23, %v78_v14  ;;  %v120_v38 = vld [vmem:[#allocation2 + $0x5] sm:$0xff]  ;;  %v108_v40 = vld [vmem:[#allocation2 + $0xe] sm:$0xff]  ;;  %v114_v43 = vmul.f32 %v113_v3, %v107_v30  ;;  %v102_v45 = vmul.f32 %v100_v2, %v95_v39  ;;  %v191_v23 = vmul.f32 0.0, %v190_v61 }
  0x50   :  { %v132_v35 = vadd.f32 %v129_v19, %v119_v27  ;;  %v161_v41 = vld [vmem:[#allocation2 + $0x12] sm:$0x7]  ;;  %v92_v44 = vadd.f32 %v89_v24, %v79_v22  ;;  %v133_v48 = vld [vmem:[#allocation2 + $0x4] sm:$0xff]  ;;  %v127_v55 = vmul.f32 %v126_v9, %v120_v38  ;;  %v115_v58 = vmul.f32 %v113_v3, %v108_v40 }
  0x51   :  { %v104_v42 = vadd.f32 %v101_v34, %v91_v33  ;;  %v121_v49 = vld [vmem:[#allocation2 + $0xd] sm:$0xff]  ;;  %v168_v59 = vmul.f32 %v165_v37, %v161_v41  ;;  %v146_v62 = vld [vmem:[#allocation2 + $0x3] sm:$0xff]  ;;  %v140_v2 = vmul.f32 %v139_v20, %v133_v48 }
  0x52   :  { %v145_v46 = vadd.f32 %v142_v36, %v132_v35  ;;  %v174_v51 = vld [vmem:[#allocation2 + $0x11] sm:$0x7]  ;;  %v105_v56 = vadd.f32 %v102_v45, %v92_v44  ;;  %v128_v5 = vmul.f32 %v126_v9, %v121_v49  ;;  %v159_v7 = vld [vmem:[#allocation2 + $0x2] sm:$0xff]  ;;  %v153_v11 = vmul.f32 %v152_v28, %v146_v62 }
  0x53   :  { %v117_v54 = vadd.f32 %v114_v43, %v104_v42  ;;  %v134_v63 = vld [vmem:[#allocation2 + $0xc] sm:$0xff]  ;;  %v181_v6 = vmul.f32 %v178_v47, %v174_v51  ;;  %v172_v12 = vld [vmem:[#allocation2 + $0x1] sm:$0xff]  ;;  %v166_v17 = vmul.f32 %v165_v37, %v159_v7 }
  0x54   :  { %v158_v60 = vadd.f32 %v155_v32, %v145_v46  ;;  %v186_v0 = vld [vmem:[#allocation2 + $0x10] sm:$0x7]  ;;  %v118_v4 = vadd.f32 %v115_v58, %v105_v56  ;;  %v141_v13 = vmul.f32 %v139_v20, %v134_v63  ;;  %v179_v22 = vmul.f32 %v178_v47, %v172_v12 }
  0x55   :  { %v130_v1 = vadd.f32 %v127_v55, %v117_v54  ;;  %v147_v8 = vld [vmem:[#allocation2 + $0xb] sm:$0xff]  ;;  %v193_v15 = vmul.f32 %v190_v61, %v186_v0 }
  0x56   :  { %v171_v52 = vadd.f32 %v168_v59, %v158_v60  ;;  %v131_v3 = vadd.f32 %v128_v5, %v118_v4  ;;  %v160_v50 = vld [vmem:[#allocation2 + $0xa] sm:$0xff]  ;;  %v154_v19 = vmul.f32 %v152_v28, %v147_v8 }
  0x57   :  { %v143_v10 = vadd.f32 %v140_v2, %v130_v1  ;;  %v167_v25 = vmul.f32 %v165_v37, %v160_v50 }
  0x58   :  { %v184_v14 = vadd.f32 %v181_v6, %v171_v52  ;;  %v144_v18 = vadd.f32 %v141_v13, %v131_v3 }
  0x59   :  { %v156_v53 = vadd.f32 %v153_v11, %v143_v10 }
  0x5a   :  { %v196_v21 = vadd.f32 %v193_v15, %v184_v14  ;;  %v157_v24 = vadd.f32 %v154_v19, %v144_v18 }
  0x5b   :  { %v169_v9 = vadd.f32 %v166_v17, %v156_v53 }
  0x5c   :  { %199 = vst [vmem:[%s277_s1 + $0x10] sm:$0x7] %v196_v21  ;;  %v170_v27 = vadd.f32 %v167_v25, %v157_v24 }
  0x5d   :  { %v182_v20 = vadd.f32 %v179_v22, %v169_v9 }
  0x5e   :  { %v183_v30 = vadd.f32 %v180_v26, %v170_v27 }
  0x5f   :  { %v194_v29 = vadd.f32 %v191_v23, %v182_v20 }
  0x60   :  { %v195_v28 = vadd.f32 %v192_v31, %v183_v30 }
  0x61   :  { %197 = vst [vmem:[%s277_s1] sm:$0xff] %v194_v29 }
  0x62   :  { %198 = vst [vmem:[%s277_s1 + $0x8] sm:$0xff] %v195_v28 }

</bundles_post_ra>
